<compile_context>
chip_gen: v7x
topology: tpu7x:2x2x1
jax: 0.10.0
libtpu: 0.0.40
codegen_flags: <defaults>
</compile_context>

<pallas_src>
import functools

import jax
import jax.numpy as jnp
from jax import lax
from jax.experimental import pallas as pl
from jax.experimental.pallas import tpu as pltpu

ALPHA = (0.8, 1.2, 0.8, 1.0, 0.8)
GAMMA = 2.0

_LANES = 128
_MAX_TILE_N = 131072   # ~16 MiB double-buffered (pred + target blocks), fits every gen


def _round_up(x, m):
    return ((x + m - 1) // m) * m


def _focal_loss_kernel(pred_ref, target_ref, out_ref, *,
                       alpha, gamma, n_total, bf16_exp):
    i = pl.program_id(0)

    pred = pred_ref[...].astype(jnp.float32)     # (C, tile_n)
    tgt = target_ref[...]                        # (1, tile_n) int32
    c, tile_n = pred.shape

    # log-softmax over the class axis (sublanes) == softmax(dim=1) in PyTorch.
    m = jnp.max(pred, axis=0, keepdims=True)                    # (1, tile_n)
    shifted = pred - m                                          # (C, tile_n)
    if bf16_exp:
        # bf16 EUP path (v6e/v7x only): ~2x throughput on the dominant exps.
        e = jnp.exp(shifted.astype(jnp.bfloat16)).astype(jnp.float32)
    else:
        e = jnp.exp(shifted)
    sum_e = jnp.sum(e, axis=0, keepdims=True)                   # (1, tile_n)
    log_sum = jnp.log(sum_e)                                    # (1, tile_n)

    # Per-class unrolled selects (C is a small compile-time constant):
    # true-class logit, true-class exp, and alpha[target] with alpha baked in
    # (no alpha input, no (C, tile_n) one-hot, no extra sublane reductions).
    zeros = jnp.zeros((1, tile_n), jnp.float32)
    pred_true, e_true, at = zeros, zeros, zeros
    for k in range(c):
        sel = tgt == k                                          # (1, tile_n)
        pred_true = jnp.where(sel, pred[k:k + 1, :], pred_true)
        e_true = jnp.where(sel, e[k:k + 1, :], e_true)
        at = jnp.where(sel, jnp.float32(alpha[k]), at)

    # pt from the existing exp table: approx EUP reciprocal + 1 Newton step
    # (VPU-only) instead of a second full-tile exp.  sum_e >= 1 always.
    inv = pl.reciprocal(sum_e, approx=True)
    inv = inv * (2.0 - sum_e * inv)
    pt = e_true * inv                                           # (1, tile_n)
    log_pt = (pred_true - m) - log_sum                          # (1, tile_n)

    one_minus_pt = 1.0 - pt
    if gamma == 2.0:
        mod = one_minus_pt * one_minus_pt                       # VPU only, no EUP pow
    else:
        mod = jnp.power(one_minus_pt, gamma)
    focal = -at * mod * log_pt                                  # (1, tile_n)

    # Mask the ragged tail (no wrapper-side padding).  Must stay AFTER all
    # transcendental math: tail columns may hold garbage -> NaN/Inf, the
    # select simply discards them.
    col = i * tile_n + lax.broadcasted_iota(jnp.int32, (1, tile_n), 1)
    focal = jnp.where(col < n_total, focal, 0.0)

    # Lane-dense (1, 128) partial-sum block; only lane 0 carries the tile sum.
    total = jnp.sum(focal)
    lane = lax.broadcasted_iota(jnp.int32, (1, _LANES), 1)
    out_ref[...] = jnp.where(lane == 0, total, 0.0)


def focal_loss(pred, target, alpha=ALPHA, gamma=GAMMA, tile_n=None,
               bf16_exp=False, pred_is_cn=False):
    """pred: (N, C) logits (any float dtype), or (C, N) if pred_is_cn=True;
    target: (N,) int class ids.  Returns the scalar mean focal loss (f32)."""
    if pred_is_cn:
        c, n = pred.shape
        pred_t = pred                     # producer already lane-dense: no copy
    else:
        n, c = pred.shape
        pred_t = pred.T                   # the one remaining wrapper copy

    if tile_n is None:
        # >=2 grid steps when N allows (v7x megacore), capped by VMEM budget.
        tile_n = min(_MAX_TILE_N, _round_up(pl.cdiv(n, 2), _LANES))
    tile_n = max(_LANES, _round_up(tile_n, _LANES))
    num_tiles = pl.cdiv(n, tile_n)

    target_2d = target.astype(jnp.int32).reshape(1, n)   # reshape only, no pad

    kernel = functools.partial(
        _focal_loss_kernel,
        alpha=tuple(float(a) for a in alpha),
        gamma=float(gamma),
        n_total=n,
        bf16_exp=bf16_exp,
    )

    partials = pl.pallas_call(
        kernel,
        out_shape=jax.ShapeDtypeStruct((1, num_tiles * _LANES), jnp.float32),
        grid=(num_tiles,),
        in_specs=[
            pl.BlockSpec((c, tile_n), lambda i: (0, i)),   # pred (C, N) tile
            pl.BlockSpec((1, tile_n), lambda i: (0, i)),   # target (1, N) tile
        ],
        out_specs=pl.BlockSpec((1, _LANES), lambda i: (0, i)),
        compiler_params=pltpu.CompilerParams(
            dimension_semantics=("parallel",),
            vmem_limit_bytes=32 * 1024 * 1024,
        ),
    )(pred_t, target_2d)

    # Final reduction + mean over the TRUE batch size (padding already masked).
    return jnp.sum(partials) / jnp.float32(n)


def _focal_loss_ref(pred, target, alpha=ALPHA, gamma=GAMMA):
    alpha = jnp.asarray(alpha, dtype=jnp.float32)
    p = jax.nn.softmax(pred.astype(jnp.float32), axis=1)
    one_hot = jax.nn.one_hot(target, pred.shape[1], dtype=jnp.float32)
    pt = jnp.sum(one_hot * p, axis=1)
    at = alpha[target]
    return jnp.mean(-at * (1.0 - pt) ** gamma * jnp.log(pt))


if __name__ == "__main__":
    key = jax.random.PRNGKey(0)
    k_pred, k_tgt = jax.random.split(key)

    C = len(ALPHA)  # 5 classes (alpha has 5 entries)

    # Small shape consistent with the module: batch of logits over 5 classes.
    N = 8
    pred = jax.random.normal(k_pred, (N, C), dtype=jnp.float32)
    target = jax.random.randint(k_tgt, (N,), 0, C, dtype=jnp.int32)

    loss = focal_loss(pred, target)
    jax.block_until_ready(loss)
    ref = _focal_loss_ref(pred, target)
    assert jnp.allclose(loss, ref, rtol=1e-4, atol=1e-5), (loss, ref)

    # Multi-tile grid + ragged (unpadded) last block + batch mask.
    N2 = 300
    pred2 = jax.random.normal(k_pred, (N2, C), dtype=jnp.float32)
    target2 = jax.random.randint(k_tgt, (N2,), 0, C, dtype=jnp.int32)
    loss2 = focal_loss(pred2, target2, tile_n=128)
    jax.block_until_ready(loss2)
    ref2 = _focal_loss_ref(pred2, target2)
    assert jnp.allclose(loss2, ref2, rtol=1e-4, atol=1e-5), (loss2, ref2)

    # Auto tile selection (>=2 grid steps) + producer-side (C, N) layout path
    # (no wrapper transpose copy at all).
    loss3 = focal_loss(pred2.T, target2, pred_is_cn=True)
    jax.block_until_ready(loss3)
    assert jnp.allclose(loss3, ref2, rtol=1e-4, atol=1e-5), (loss3, ref2)

    # Optional bf16-exp EUP relief: only on generations with a bf16 EUP.
    kind = jax.devices()[0].device_kind.lower()
    if ("v6" in kind) or ("v7" in kind) or ("tpu7" in kind):
        loss4 = focal_loss(pred2, target2, bf16_exp=True)
        jax.block_until_ready(loss4)
        assert jnp.allclose(loss4, ref2, rtol=2e-2, atol=2e-2), (loss4, ref2)

    print("KERNEL_OK")
</pallas_src>

<mosaic_0001>
module attributes {stable_mosaic.version = 11 : i64} {
  func.func @_focal_loss_kernel(%arg0: i32, %arg1: memref<5x128xf32, #tpu.memory_space<vmem>>, %arg2: memref<1x128xi32, #tpu.memory_space<vmem>>, %arg3: memref<1x128xf32, #tpu.memory_space<vmem>>) attributes {dimension_semantics = [#tpu.dimension_semantics<parallel>], iteration_bounds = array<i64: 1>, scalar_prefetch = 0 : i64, scratch_operands = 0 : i64, tpu.core_type = #tpu.core_type<tc>, window_params = [{transform_indices = @transform_0, window_bounds = array<i64: 5, 128>}, {transform_indices = @transform_1, window_bounds = array<i64: 1, 128>}, {transform_indices = @transform_2, window_bounds = array<i64: 1, 128>}]} {
    %c0 = arith.constant 0 : index
    %c0_0 = arith.constant 0 : index
    %0 = vector.load %arg1[%c0, %c0_0] : memref<5x128xf32, #tpu.memory_space<vmem>>, vector<5x128xf32>
    %c0_1 = arith.constant 0 : index
    %c0_2 = arith.constant 0 : index
    %1 = vector.load %arg2[%c0_1, %c0_2] : memref<1x128xi32, #tpu.memory_space<vmem>>, vector<1x128xi32>
    %cst = arith.constant dense<0xFF800000> : vector<128xf32>
    %2 = vector.multi_reduction <maximumf>, %0, %cst [0] : vector<5x128xf32> to vector<128xf32>
    %3 = vector.shape_cast %2 : vector<128xf32> to vector<1x128xf32>
    %4 = vector.broadcast %3 : vector<1x128xf32> to vector<5x128xf32>
    %5 = arith.subf %0, %4 : vector<5x128xf32>
    %6 = math.exp %5 : vector<5x128xf32>
    %cst_3 = arith.constant dense<0.000000e+00> : vector<128xf32>
    %7 = vector.multi_reduction <add>, %6, %cst_3 [0] : vector<5x128xf32> to vector<128xf32>
    %8 = vector.shape_cast %7 : vector<128xf32> to vector<1x128xf32>
    %9 = math.log %8 : vector<1x128xf32>
    %cst_4 = arith.constant 0.000000e+00 : f32
    %10 = vector.broadcast %cst_4 : f32 to vector<1x128xf32>
    %c0_i32 = arith.constant 0 : i32
    %11 = vector.broadcast %c0_i32 : i32 to vector<1x128xi32>
    %12 = arith.cmpi eq, %1, %11 : vector<1x128xi32>
    %13 = vector.extract_strided_slice %0 {offsets = [0, 0], sizes = [1, 128], strides = [1, 1]} : vector<5x128xf32> to vector<1x128xf32>
    %14 = arith.select %12, %13, %10 : vector<1x128xi1>, vector<1x128xf32>
    %15 = vector.extract_strided_slice %6 {offsets = [0, 0], sizes = [1, 128], strides = [1, 1]} : vector<5x128xf32> to vector<1x128xf32>
    %16 = arith.select %12, %15, %10 : vector<1x128xi1>, vector<1x128xf32>
    %cst_5 = arith.constant 8.000000e-01 : f32
    %17 = vector.broadcast %cst_5 : f32 to vector<1x128xf32>
    %18 = arith.select %12, %17, %10 : vector<1x128xi1>, vector<1x128xf32>
    %c1_i32 = arith.constant 1 : i32
    %19 = vector.broadcast %c1_i32 : i32 to vector<1x128xi32>
    %20 = arith.cmpi eq, %1, %19 : vector<1x128xi32>
    %21 = vector.extract_strided_slice %0 {offsets = [1, 0], sizes = [1, 128], strides = [1, 1]} : vector<5x128xf32> to vector<1x128xf32>
    %22 = arith.select %20, %21, %14 : vector<1x128xi1>, vector<1x128xf32>
    %23 = vector.extract_strided_slice %6 {offsets = [1, 0], sizes = [1, 128], strides = [1, 1]} : vector<5x128xf32> to vector<1x128xf32>
    %24 = arith.select %20, %23, %16 : vector<1x128xi1>, vector<1x128xf32>
    %cst_6 = arith.constant 1.200000e+00 : f32
    %25 = vector.broadcast %cst_6 : f32 to vector<1x128xf32>
    %26 = arith.select %20, %25, %18 : vector<1x128xi1>, vector<1x128xf32>
    %c2_i32 = arith.constant 2 : i32
    %27 = vector.broadcast %c2_i32 : i32 to vector<1x128xi32>
    %28 = arith.cmpi eq, %1, %27 : vector<1x128xi32>
    %29 = vector.extract_strided_slice %0 {offsets = [2, 0], sizes = [1, 128], strides = [1, 1]} : vector<5x128xf32> to vector<1x128xf32>
    %30 = arith.select %28, %29, %22 : vector<1x128xi1>, vector<1x128xf32>
    %31 = vector.extract_strided_slice %6 {offsets = [2, 0], sizes = [1, 128], strides = [1, 1]} : vector<5x128xf32> to vector<1x128xf32>
    %32 = arith.select %28, %31, %24 : vector<1x128xi1>, vector<1x128xf32>
    %cst_7 = arith.constant 8.000000e-01 : f32
    %33 = vector.broadcast %cst_7 : f32 to vector<1x128xf32>
    %34 = arith.select %28, %33, %26 : vector<1x128xi1>, vector<1x128xf32>
    %c3_i32 = arith.constant 3 : i32
    %35 = vector.broadcast %c3_i32 : i32 to vector<1x128xi32>
    %36 = arith.cmpi eq, %1, %35 : vector<1x128xi32>
    %37 = vector.extract_strided_slice %0 {offsets = [3, 0], sizes = [1, 128], strides = [1, 1]} : vector<5x128xf32> to vector<1x128xf32>
    %38 = arith.select %36, %37, %30 : vector<1x128xi1>, vector<1x128xf32>
    %39 = vector.extract_strided_slice %6 {offsets = [3, 0], sizes = [1, 128], strides = [1, 1]} : vector<5x128xf32> to vector<1x128xf32>
    %40 = arith.select %36, %39, %32 : vector<1x128xi1>, vector<1x128xf32>
    %cst_8 = arith.constant 1.000000e+00 : f32
    %41 = vector.broadcast %cst_8 : f32 to vector<1x128xf32>
    %42 = arith.select %36, %41, %34 : vector<1x128xi1>, vector<1x128xf32>
    %c4_i32 = arith.constant 4 : i32
    %43 = vector.broadcast %c4_i32 : i32 to vector<1x128xi32>
    %44 = arith.cmpi eq, %1, %43 : vector<1x128xi32>
    %45 = vector.extract_strided_slice %0 {offsets = [4, 0], sizes = [1, 128], strides = [1, 1]} : vector<5x128xf32> to vector<1x128xf32>
    %46 = arith.select %44, %45, %38 : vector<1x128xi1>, vector<1x128xf32>
    %47 = vector.extract_strided_slice %6 {offsets = [4, 0], sizes = [1, 128], strides = [1, 1]} : vector<5x128xf32> to vector<1x128xf32>
    %48 = arith.select %44, %47, %40 : vector<1x128xi1>, vector<1x128xf32>
    %cst_9 = arith.constant 8.000000e-01 : f32
    %49 = vector.broadcast %cst_9 : f32 to vector<1x128xf32>
    %50 = arith.select %44, %49, %42 : vector<1x128xi1>, vector<1x128xf32>
    %51 = tpu.reciprocal %8 {approx = true} : vector<1x128xf32> -> vector<1x128xf32>
    %52 = arith.mulf %8, %51 : vector<1x128xf32>
    %cst_10 = arith.constant 2.000000e+00 : f32
    %53 = vector.broadcast %cst_10 : f32 to vector<1x128xf32>
    %54 = arith.subf %53, %52 : vector<1x128xf32>
    %55 = arith.mulf %51, %54 : vector<1x128xf32>
    %56 = arith.mulf %48, %55 : vector<1x128xf32>
    %57 = arith.subf %46, %3 : vector<1x128xf32>
    %58 = arith.subf %57, %9 : vector<1x128xf32>
    %cst_11 = arith.constant 1.000000e+00 : f32
    %59 = vector.broadcast %cst_11 : f32 to vector<1x128xf32>
    %60 = arith.subf %59, %56 : vector<1x128xf32>
    %61 = arith.mulf %60, %60 : vector<1x128xf32>
    %cst_12 = arith.constant 0.000000e+00 : f32
    %62 = vector.broadcast %cst_12 : f32 to vector<1x128xf32>
    %63 = arith.subf %62, %50 : vector<1x128xf32>
    %64 = arith.mulf %63, %61 : vector<1x128xf32>
    %65 = arith.mulf %64, %58 : vector<1x128xf32>
    %c128_i32 = arith.constant 128 : i32
    %66 = arith.muli %arg0, %c128_i32 : i32
    %67 = tpu.iota {dimensions = array<i32: 1>} : vector<1x128xi32>
    %68 = vector.broadcast %66 : i32 to vector<1x128xi32>
    %69 = arith.addi %68, %67 : vector<1x128xi32>
    %c8_i32 = arith.constant 8 : i32
    %70 = vector.broadcast %c8_i32 : i32 to vector<1x128xi32>
    %71 = arith.cmpi slt, %69, %70 : vector<1x128xi32>
    %cst_13 = arith.constant 0.000000e+00 : f32
    %72 = vector.broadcast %cst_13 : f32 to vector<1x128xf32>
    %73 = arith.select %71, %65, %72 : vector<1x128xi1>, vector<1x128xf32>
    %74 = vector.shape_cast %73 : vector<1x128xf32> to vector<1x1x128xf32>
    %cst_14 = arith.constant dense<0.000000e+00> : vector<1xf32>
    %75 = vector.multi_reduction <add>, %74, %cst_14 [1, 2] : vector<1x1x128xf32> to vector<1xf32>
    %76 = vector.shape_cast %75 : vector<1xf32> to vector<1x1x1xf32>
    %77 = vector.extract %76[0, 0, 0] : f32 from vector<1x1x1xf32>
    %78 = tpu.iota {dimensions = array<i32: 1>} : vector<1x128xi32>
    %c0_i32_15 = arith.constant 0 : i32
    %79 = vector.broadcast %c0_i32_15 : i32 to vector<1x128xi32>
    %80 = arith.cmpi eq, %78, %79 : vector<1x128xi32>
    %cst_16 = arith.constant 0.000000e+00 : f32
    %81 = vector.broadcast %77 : f32 to vector<1x128xf32>
    %82 = vector.broadcast %cst_16 : f32 to vector<1x128xf32>
    %83 = arith.select %80, %81, %82 : vector<1x128xi1>, vector<1x128xf32>
    %c0_17 = arith.constant 0 : index
    %c0_18 = arith.constant 0 : index
    %84 = vector.load %arg3[%c0_17, %c0_18] : memref<1x128xf32, #tpu.memory_space<vmem>>, vector<1x128xf32>
    tpu.vector_store %arg3[%c0_17, %c0_18], %83 {strides = array<i32>} : memref<1x128xf32, #tpu.memory_space<vmem>>, vector<1x128xf32>,
    return
  }
  func.func @transform_0(%arg0: i32) -> (i32, i32) {
    %c0_i32 = arith.constant 0 : i32
    %c0_i32_0 = arith.constant 0 : i32
    return %c0_i32, %arg0 : i32, i32
  }
  func.func @transform_1(%arg0: i32) -> (i32, i32) {
    %c0_i32 = arith.constant 0 : i32
    %c0_i32_0 = arith.constant 0 : i32
    return %c0_i32, %arg0 : i32, i32
  }
  func.func @transform_2(%arg0: i32) -> (i32, i32) {
    %c0_i32 = arith.constant 0 : i32
    %c0_i32_0 = arith.constant 0 : i32
    return %c0_i32, %arg0 : i32, i32
  }
}

</mosaic_0001>

<bundles_post_ra>
// kernel: tpu_custom_call.1
= control target key start
LH: loop header
LB: loop body
LE: loop exit
PB: predicated region body
PF: predicated region fallthrough
CT: control target
= control target key end

     0   :  { %7 = vsyncpa [#allocation3], 0  ;;  %s321_s0 = inlined_call_operand.hbm [shape: f32[5,8], index: 0, kind: input, shape index: {}]   ;;  %s322_s1 = inlined_call_operand.vmem [shape: s32[1,8], index: 1, kind: input, shape index: {}]   ;;  %s323_s2 = inlined_call_operand.hbm [shape: f32[1,128], index: 2, kind: output, shape index: {}]  }
   0x1   :  { %8 = vsyncpa [#allocation4], 0  ;;  %s264_s9 = smov [#allocation2]   ;;  %s216_s13 = scalar_lea.hbm %s321_s0, 128 }
   0x2   :  { %s15_s10 = sshll.u32 %s264_s9, 4  ;;  %p217_p0 = scmp.ne.s32.totalorder %s321_s0, %s216_s13  ;;  %s16_s10 = int_to_ptr.vmem [resolvable:$true] %s15_s10 }
   0x3   :  { %p220_p1 = scmp.lt.u32.totalorder %s216_s13, %s321_s0 }
   0x5   :  { %p222_p2 = pnand %p220_p1, %p217_p0 }
   0x7   :  { %225 = shalt.err (!%p222_p2)
}
   0x8   :  { %s226_s18 = scalar_lea.vmem %s16_s10, 128  ;;  %p231_p4 = scmp.lt.s32.totalorder %s16_s10, %s16_s10 }
   0x9   :  { %p227_p3 = scmp.ne.s32.totalorder %s16_s10, %s226_s18  ;;  %p232_p5 = scmp.lt.s32.totalorder %s226_s18, %s226_s18 }
   0xb   :  { %p233_p6 = por %p232_p5, %p231_p4 }
   0xd   :  { %p234_p7 = pnand %p233_p6, %p227_p3 }
   0xf   :  { %237 = shalt.err (!%p234_p7)
}
  0x10   :  { %18 = dma.hbm_to_vmem [thread:$0]  %s321_s0, 128, %s16_s10, [#allocation3]  }
  0x11   :  { %260 = dma.done.wait [#allocation3], 128  }
  0x12   :  { %261 = vsyncadd [#allocation3], 4294967168  ;;  %vm26_vm0 = vcmask 1044480   ;;  %v24_v0 = vld [vmem:[#allocation2] sm:$0x1f]  ;;  %v55_v12 = vlaneseq  ;;  %v266_v37 = vmov 0.0  }
  0x13   :  { %v27_v1 = vsel %vm26_vm0, %v24_v0, -inf  ;;  %v265_v10 = vmov 1966171168   ;;  %v25_v25 = vld [vmem:[%s322_s1] sm:$0x1]  ;;  %v119_v35 = vcombine.high %v24_v0, %v24_v0  ;;  %vm173_vm7 = vcmask 1040384  }
  0x14   :  { %v28_v2 = vrot.slane %v27_v1, 4  ;;  %v53_v11 = vunpack.c.l.s4 %v265_v10  ;;  %v56_v15 = vshrl.u32 %v55_v12, 7  ;;  %vm46_vm1 = vcmp.eq.s32.totalorder %v25_v25, 0  ;;  %s267_s1 = smov [#allocation5]  }
  0x15   :  { %vm50_vm2 = vcmp.eq.s32.totalorder %v25_v25, 1  ;;  %v47_v33 = vsel %vm46_vm1, %v24_v0, 0.0  ;;  %v49_v38 = vsel %vm46_vm1, 0.8, %v266_v37  ;;  %vm102_vm3 = vcmp.eq.s32.totalorder %v25_v25, 2  ;;  %s194_s22 = sshll.u32 %s267_s1, 4  ;;  %s195_s22 = int_to_ptr.vmem [resolvable:$true] %s194_s22 }
  0x16   :  { %v29_v3 = vmax.f32 %v27_v1, %v28_v2  ;;  %v54_v14 = vunpack.c.0.s8 %v53_v11  ;;  %v101_v45 = vsel %vm50_vm2, 1.2, %v49_v38  ;;  %vm110_vm4 = vcmp.eq.s32.totalorder %v25_v25, 3  ;;  %s238_s24 = scalar_lea.vmem %s195_s22, 16  ;;  %s242_s25 = scalar_lea.vmem %s195_s22, 32 }
  0x17   :  { %v109_v51 = vsel %vm102_vm3, 0.8, %v101_v45  ;;  %vm118_vm5 = vcmp.eq.s32.totalorder %v25_v25, 4  ;;  %p239_p8 = scmp.ne.s32.totalorder %s195_s22, %s238_s24  ;;  %p243_p9 = scmp.lt.s32.totalorder %s195_s22, %s195_s22 }
  0x18   :  { %v30_v4 = vrot.slane %v29_v3, 2  ;;  %v57_v19 = vsub.s32 %v54_v14, %v56_v15  ;;  %v117_v57 = vsel %vm110_vm4, 1.0, %v109_v51  ;;  %p244_p10 = scmp.lt.s32.totalorder %s242_s25, %s238_s24 }
  0x19   :  { %v153_v63 = vsel %vm118_vm5, 0.8, %v117_v57 }
  0x1a   :  { %v31_v5 = vmax.f32 %v29_v3, %v30_v4  ;;  %v58_v22 = vrot.slane %v24_v0, %v57_v19  ;;  %v126_v43 = vrot.slane %v119_v35, %v57_v19  ;;  %v163_v4 = vsub.f32 0.0, %v153_v63  ;;  %p245_p11 = por %p244_p10, %p243_p9 }
  0x1c   :  { %v32_v6 = vrot.slane %v31_v5, 1  ;;  %v59_v27 = vcombine.high %v58_v22, %v58_v22  ;;  %v66_v29 = vrot.slane %v58_v22, %v57_v19  ;;  %v133_v52 = vrot.slane %v126_v43, %v57_v19  ;;  %p246_p12 = pnand %p245_p11, %p239_p8 }
  0x1e   :  { %v296_v7 = vmax.f32 %v31_v5, %v32_v6  ;;  %v73_v31 = vrot.slane %v59_v27, %v57_v19  ;;  %v103_v39 = vcombine.high %v66_v29, %v66_v29  ;;  %v168_v5 = vand.u32 127, %v55_v12 }
  0x20   :  { %v34_v8 = vsub.f32 %v24_v0, %v296_v7  ;;  %v75_v41 = vsel %vm50_vm2, %v73_v31, %v47_v33  ;;  %v111_v46 = vcombine.high %v73_v31, %v73_v31  ;;  %vm171_vm6 = vcmp.lt.s32.totalorder %v168_v5, 8 }
  0x21   :  { %v105_v48 = vsel %vm102_vm3, %v103_v39, %v75_v41  ;;  %vm184_vm8 = vcmp.eq.s32.totalorder %v168_v5, 0 }
  0x22   :  { %v35_v9 = vmul.f32 1.442695, %v34_v8  ;;  %v113_v54 = vsel %vm110_vm4, %v111_v46, %v105_v48 }
  0x23   :  { %v135_v60 = vsel %vm118_vm5, %v133_v52, %v113_v54 }
  0x24   :  { %210 = vpow2.f32 %v35_v9  ;;  %v159_v2 = vsub.f32 %v135_v60, %v296_v7 }
  0x2e   :  { %v211_v13 = vpop.eup %210 }
  0x2f   :  { %v37_v16 = vsel %vm26_vm0, %v211_v13, 0.0  ;;  %v83_v23 = vrot.slane %v211_v13, %v57_v19  ;;  %v48_v34 = vsel %vm46_vm1, %v211_v13, 0.0  ;;  %v136_v36 = vcombine.high %v211_v13, %v211_v13 }
  0x30   :  { %v38_v17 = vrot.slane %v37_v16, 4 }
  0x31   :  { %v84_v28 = vcombine.high %v83_v23, %v83_v23  ;;  %v91_v30 = vrot.slane %v83_v23, %v57_v19  ;;  %v143_v44 = vrot.slane %v136_v36, %v57_v19 }
  0x32   :  { %v39_v18 = vadd.f32 %v38_v17, %v37_v16 }
  0x33   :  { %v98_v32 = vrot.slane %v84_v28, %v57_v19  ;;  %v106_v40 = vcombine.high %v91_v30, %v91_v30  ;;  %v150_v53 = vrot.slane %v143_v44, %v57_v19 }
  0x34   :  { %v40_v20 = vrot.slane %v39_v18, 2 }
  0x35   :  { %v100_v42 = vsel %vm50_vm2, %v98_v32, %v48_v34  ;;  %v114_v47 = vcombine.high %v98_v32, %v98_v32 }
  0x36   :  { %v41_v21 = vadd.f32 %v40_v20, %v39_v18  ;;  %v108_v49 = vsel %vm102_vm3, %v106_v40, %v100_v42 }
  0x37   :  { %v116_v55 = vsel %vm110_vm4, %v114_v47, %v108_v49 }
  0x38   :  { %v42_v24 = vrot.slane %v41_v21, 1  ;;  %v152_v61 = vsel %vm118_vm5, %v150_v53, %v116_v55 }
  0x3a   :  { %v43_v26 = vadd.f32 %v42_v24, %v41_v21 }
  0x3c   :  { %212 = vrcp.f32 %v43_v26 }
  0x3d   :  { %214 = vlog2.f32 %v43_v26 }
  0x46   :  { %v213_v50 = vpop.eup %212 }
  0x47   :  { %v155_v56 = vmul.f32 %v213_v50, %v43_v26  ;;  %v215_v59 = vpop.eup %214 }
  0x48   :  { %v45_v0 = vmul.f32 0.6931472, %v215_v59 }
  0x49   :  { %v156_v58 = vsub.f32 2.0, %v155_v56 }
  0x4a   :  { %v160_v6 = vsub.f32 %v159_v2, %v45_v0 }
  0x4b   :  { %v157_v62 = vmul.f32 %v213_v50, %v156_v58 }
  0x4d   :  { %v158_v1 = vmul.f32 %v157_v62, %v152_v61 }
  0x4f   :  { %v161_v3 = vsub.f32 1.0, %v158_v1 }
  0x51   :  { %v162_v8 = vmul.f32 %v161_v3, %v161_v3 }
  0x53   :  { %v164_v9 = vmul.f32 %v163_v4, %v162_v8 }
  0x55   :  { %v165_v10 = vmul.f32 %v164_v9, %v160_v6 }
  0x57   :  { %v172_v11 = vsel %vm171_vm6, %v165_v10, 0.0 }
  0x58   :  { %v174_v13 = vsel %vm173_vm7, %v172_v11, 0.0 }
  0x59   :  { %175 = vadd.xlane.f32.xlu0 %v174_v13 }
  0xe6   :  { %v176_v14 = vpop.xlane.xlu0 %175 }
  0xe7   :  { %v177_v15 = vrot.slane %v176_v14, 4 }
  0xe9   :  { %v178_v16 = vadd.f32 %v177_v15, %v176_v14 }
  0xeb   :  { %v179_v17 = vrot.slane %v178_v16, 2 }
  0xed   :  { %v180_v18 = vadd.f32 %v179_v17, %v178_v16 }
  0xef   :  { %v181_v19 = vrot.slane %v180_v18, 1 }
  0xf1   :  { %v182_v7 = vadd.f32 %v181_v19, %v180_v18 }
  0xf3   :  { %203 = vpush %v182_v7 }
 0x124   :  { %s204_s23 = spop %203 }
 0x125   :  { %v185_v12 = vstv %s204_s23 }
 0x126   :  { %v186_v20 = vsel %vm184_vm8, %v185_v12, 0.0 }
 0x127   :  { %187 = vst [vmem:[#allocation5] sm:$0x1] %v186_v20 }
 0x128   :  { %249 = shalt.err (!%p246_p12)
}
 0x129   :  { %s250_s28 = scalar_lea.hbm %s323_s2, 16 }
 0x12a   :  { %p251_p13 = scmp.ne.s32.totalorder %s323_s2, %s250_s28  ;;  %p254_p0 = scmp.lt.u32.totalorder %s250_s28, %s323_s2 }
 0x12c   :  { %p256_p1 = pnand %p254_p0, %p251_p13 }
 0x12e   :  { %259 = shalt.err (!%p256_p1)
}
 0x12f   :  { %197 = dma.vmem_to_hbm [thread:$0]  %s195_s22, 16, %s323_s2, [#allocation4]  }
 0x130   :  { %262 = dma.done.wait [#allocation4], 16  }
 0x131   :  { %263 = vsyncadd [#allocation4], 4294967280 }
 0x132   :  { %201 = vsyncpa [#allocation3], 1 }
 0x133   :  { %202 = vsyncpa [#allocation4], 1 }

</bundles_post_ra>
